<compile_context>
chip_gen: v7x
topology: tpu7x:2x2x1
jax: 0.10.0
libtpu: 0.0.40
codegen_flags: <defaults>
</compile_context>

<pallas_src>
import jax
import jax.numpy as jnp
from jax.experimental import pallas as pl
from jax.experimental.pallas import tpu as pltpu


C_IN = 123
C_OUT = 369


def _decoder_kernel(x_ref, wt_ref, b_ref, o_ref):
    # x_ref : (C_in, THW)   activation tile (bf16 or f32)
    # wt_ref: (C_out, C_in) transposed 1x1 weight (bf16 or f32), VMEM-resident
    # b_ref : (C_out, 1)    bias (f32)
    # o_ref : (C_out, THW)  output tile (f32), lane-dense last dim
    acc = jnp.dot(wt_ref[...], x_ref[...], preferred_element_type=jnp.float32)
    o_ref[...] = (acc + b_ref[...]).astype(o_ref.dtype)


def simple_decoder(x_nchw, weight, bias, *, spatial_tile=2048,
                   compute_dtype=jnp.bfloat16):
    """Forward pass of SimpleDecoder.

    x_nchw : (N, C_in, H, W) float32
    weight : (C_in, C_out, 1, 1) float32  (ConvTranspose2d weight layout)
    bias   : (C_out,) float32
    returns: (N, C_out, H, W) float32
    """
    N, C_in, H, W = x_nchw.shape
    C_out = weight.shape[1]
    HW = H * W
    out_dtype = x_nchw.dtype

    # Free reshape (collapse of contiguous trailing dims) -- no transpose of x.
    x3 = x_nchw.reshape(N, C_in, HW)
    # Tiny one-time parameter reshuffles (123x369 ~ 180 KB).
    wt = jnp.transpose(weight[:, :, 0, 0])          # (C_out, C_in)
    b2 = bias.astype(jnp.float32).reshape(C_out, 1)  # (C_out, 1)

    if compute_dtype is not None:
        x3 = x3.astype(compute_dtype)
        wt = wt.astype(compute_dtype)

    # Spatial tile: multiple of 128 (lane-dense output stores) when possible,
    # otherwise the whole HW extent as a single full-dim block.
    if HW % 128 == 0:
        thw = min(spatial_tile, HW)
        thw = max(128, (thw // 128) * 128)
    else:
        thw = HW
    grid = (N, pl.cdiv(HW, thw))

    in_itemsize = jnp.dtype(x3.dtype).itemsize
    out_itemsize = jnp.dtype(out_dtype).itemsize
    cost = pl.CostEstimate(
        flops=2 * N * HW * C_in * C_out,
        transcendentals=0,
        bytes_accessed=(N * HW * C_in * in_itemsize
                        + C_in * C_out * in_itemsize
                        + C_out * 4
                        + N * HW * C_out * out_itemsize),
    )

    out3 = pl.pallas_call(
        _decoder_kernel,
        out_shape=jax.ShapeDtypeStruct((N, C_out, HW), out_dtype),
        grid=grid,
        in_specs=[
            # Activation tile: (C_in, thw), batch dim squeezed out.
            pl.BlockSpec((None, C_in, thw), lambda n, j: (n, 0, j)),
            # Weight / bias stay VMEM-resident across the whole grid.
            pl.BlockSpec((C_out, C_in), lambda n, j: (0, 0)),
            pl.BlockSpec((C_out, 1), lambda n, j: (0, 0)),
        ],
        out_specs=pl.BlockSpec((None, C_out, thw), lambda n, j: (n, 0, j)),
        compiler_params=pltpu.CompilerParams(
            dimension_semantics=("parallel", "parallel"),
            vmem_limit_bytes=32 * 1024 * 1024,
        ),
        cost_estimate=cost,
    )(x3, wt, b2)

    # Free reshape back to NCHW (no transpose needed: layout already NC(HW)).
    return out3.reshape(N, C_out, H, W)


if __name__ == "__main__":
    key = jax.random.PRNGKey(0)
    k_x, k_w, k_b = jax.random.split(key, 3)

    # Small example consistent with the module: batch=2, 123 in-channels, 16x16 spatial.
    N, H, W = 2, 16, 16
    x = jax.random.normal(k_x, (N, C_IN, H, W), dtype=jnp.float32)

    # Deterministic synthetic parameters (ConvTranspose2d weight: (in, out, 1, 1)).
    weight = 0.02 * jax.random.normal(k_w, (C_IN, C_OUT, 1, 1), dtype=jnp.float32)
    bias = 0.02 * jax.random.normal(k_b, (C_OUT,), dtype=jnp.float32)

    out = simple_decoder(x, weight, bias)
    out = jax.block_until_ready(out)
    assert out.shape == (N, C_OUT, H, W)

    # Tight reference check against the same bf16-rounded operands the kernel sees
    # (MXU consumes bf16 inputs with f32 accumulation).
    xb = x.astype(jnp.bfloat16).astype(jnp.float32)
    wb = weight[:, :, 0, 0].astype(jnp.bfloat16).astype(jnp.float32)
    ref_bf16 = jnp.einsum("nihw,io->nohw", xb, wb) + bias[None, :, None, None]
    assert jnp.allclose(out, ref_bf16, atol=1e-3, rtol=1e-3)

    # Loose sanity check against the full-f32 ConvTranspose2d(1x1) semantics.
    ref_f32 = jnp.einsum("nihw,io->nohw", x, weight[:, :, 0, 0]) + bias[None, :, None, None]
    assert jnp.allclose(out, ref_f32, atol=5e-2, rtol=5e-2)

    print("KERNEL_OK")
</pallas_src>

<mosaic_0001>
module attributes {stable_mosaic.version = 11 : i64} {
  func.func @_decoder_kernel(%arg0: i32, %arg1: i32, %arg2: memref<1x123x256xbf16, #tpu.memory_space<vmem>>, %arg3: memref<369x123xbf16, #tpu.memory_space<vmem>>, %arg4: memref<369x1xf32, #tpu.memory_space<vmem>>, %arg5: memref<1x369x256xf32, #tpu.memory_space<vmem>>) attributes {dimension_semantics = [#tpu.dimension_semantics<parallel>, #tpu.dimension_semantics<parallel>], iteration_bounds = array<i64: 2, 1>, scalar_prefetch = 0 : i64, scratch_operands = 0 : i64, tpu.core_type = #tpu.core_type<tc>, window_params = [{transform_indices = @transform_0, window_bounds = array<i64: 1, 123, 256>}, {pipeline_mode = #tpu.pipeline_mode<synchronous>, transform_indices = @transform_1, window_bounds = array<i64: 369, 123>}, {pipeline_mode = #tpu.pipeline_mode<synchronous>, transform_indices = @transform_2, window_bounds = array<i64: 369, 1>}, {transform_indices = @transform_3, window_bounds = array<i64: 1, 369, 256>}]} {
    %c0 = arith.constant 0 : index
    %c0_0 = arith.constant 0 : index
    %0 = vector.load %arg3[%c0, %c0_0] : memref<369x123xbf16, #tpu.memory_space<vmem>>, vector<369x123xbf16>
    %c0_1 = arith.constant 0 : index
    %c0_2 = arith.constant 0 : index
    %c0_3 = arith.constant 0 : index
    %1 = vector.load %arg2[%c0_1, %c0_2, %c0_3] : memref<1x123x256xbf16, #tpu.memory_space<vmem>>, vector<1x123x256xbf16>
    %2 = vector.shape_cast %1 : vector<1x123x256xbf16> to vector<123x256xbf16>
    %cst = arith.constant dense<0.000000e+00> : vector<369x256xf32>
    %3 = tpu.matmul %0, %2, %cst {dimension_numbers = #tpu.dot_dimension_numbers<[1], [0], [0], [1], [0, 0, 1, 1], [], []>} : vector<369x123xbf16>, vector<123x256xbf16>, vector<369x256xf32> -> vector<369x256xf32>
    %c0_4 = arith.constant 0 : index
    %c0_5 = arith.constant 0 : index
    %4 = vector.load %arg4[%c0_4, %c0_5] : memref<369x1xf32, #tpu.memory_space<vmem>>, vector<369x1xf32>
    %5 = vector.broadcast %4 : vector<369x1xf32> to vector<369x256xf32>
    %6 = arith.addf %3, %5 : vector<369x256xf32>
    %c0_6 = arith.constant 0 : index
    %c0_7 = arith.constant 0 : index
    %c0_8 = arith.constant 0 : index
    %7 = vector.load %arg5[%c0_6, %c0_7, %c0_8] : memref<1x369x256xf32, #tpu.memory_space<vmem>>, vector<1x369x256xf32>
    %8 = vector.shape_cast %7 : vector<1x369x256xf32> to vector<369x256xf32>
    %9 = vector.shape_cast %6 : vector<369x256xf32> to vector<1x369x256xf32>
    tpu.vector_store %arg5[%c0_6, %c0_7, %c0_8], %9 {strides = array<i32>} : memref<1x369x256xf32, #tpu.memory_space<vmem>>, vector<1x369x256xf32>,
    return
  }
  func.func @transform_0(%arg0: i32, %arg1: i32) -> (i32, i32, i32) {
    %c0_i32 = arith.constant 0 : i32
    %c0_i32_0 = arith.constant 0 : i32
    return %arg0, %c0_i32, %arg1 : i32, i32, i32
  }
  func.func @transform_1(%arg0: i32, %arg1: i32) -> (i32, i32) {
    %c0_i32 = arith.constant 0 : i32
    %c0_i32_0 = arith.constant 0 : i32
    %c0_i32_1 = arith.constant 0 : i32
    return %c0_i32, %c0_i32_0 : i32, i32
  }
  func.func @transform_2(%arg0: i32, %arg1: i32) -> (i32, i32) {
    %c0_i32 = arith.constant 0 : i32
    %c0_i32_0 = arith.constant 0 : i32
    %c0_i32_1 = arith.constant 0 : i32
    return %c0_i32, %c0_i32_0 : i32, i32
  }
  func.func @transform_3(%arg0: i32, %arg1: i32) -> (i32, i32, i32) {
    %c0_i32 = arith.constant 0 : i32
    %c0_i32_0 = arith.constant 0 : i32
    return %arg0, %c0_i32, %arg1 : i32, i32, i32
  }
}

</mosaic_0001>

<bundles_post_ra>
// kernel: tpu_custom_call.1
= control target key start
LH: loop header
LB: loop body
LE: loop exit
PB: predicated region body
PF: predicated region fallthrough
CT: control target
= control target key end

     0   :  { %s1501_s12 = smov 0   ;;  %s1503_s13 = smov 0   ;;  %s1999_s0 = inlined_call_operand.vmem [shape: bf16[2,123,256], index: 0, kind: input, shape index: {}]   ;;  %s2000_s1 = inlined_call_operand.vmem [shape: bf16[369,123], index: 1, kind: input, shape index: {}]   ;;  %s2001_s2 = inlined_call_operand.vmem [shape: f32[369,1], index: 2, kind: input, shape index: {}]   ;;  %s2002_s3 = inlined_call_operand.vmem [shape: f32[2,369,256], index: 3, kind: output, shape index: {}]  }
   0x1   :  { %s1505_s14 = smov 0  }
   0x2 LB: > { %s25_s15 = sadd.s32 1, %s1473_s13  ;;  %p1291_p0 = scmp.ge.s32.totalorder %s1477_s14, 1  ;;  %s1477_s14 = sphi %s1505_s14, %s13_s14   ;;  %s1473_s13 = sphi %s1503_s13, %s2004_s13   ;;  %s1469_s12 = sphi %s1501_s12, %s2003_s12  }
   0x3   : > { %p27_p1 = scmp.ge.s32.totalorder %s25_s15, 2  ;;  %p158_p2 = scmp.lt.s32.totalorder %s1477_s14, 3 }
   0x5   : > { %s2006_s15 = smov (%p27_p1, %s25_s15), 0  ;;  %p159_p3 = pnand %p1291_p0, %p158_p2 }
   0x6   : > { %p191_p4 = scmp.lt.s32.totalorder (!%p159_p3), %s1469_s12, 1  ;;  %v274_v0 = vld [vmem:[%s2001_s2] sm:$0xff] (!%p159_p3)  ;;  %v1479_v1 = vmov (!%p159_p3), 0   ;;  %v276_v2 = vld [vmem:[%s2001_s2 + $0x10] sm:$0xff] (!%p159_p3)  ;;  %v275_v3 = vld [vmem:[%s2001_s2 + $0x8] sm:$0xff] (!%p159_p3)  ;;  %vm825_vm0 = vcmask (!%p159_p3), 1044480  }
   0x7   : > { %162 = sbr.rel (%p159_p3) target bundleno = 356 (0x164), region = 32  ;;  %1405 = vset.pattern.permute.xlu0 (!%p159_p3), %v1479_v1  ;;  %1406 = vset.pattern.permute.xlu1 (!%p159_p3), %v1479_v1  ;;  %v277_v4 = vld [vmem:[%s2001_s2 + $0x18] sm:$0xff] (!%p159_p3)  ;;  %v278_v6 = vld [vmem:[%s2001_s2 + $0x20] sm:$0xff] (!%p159_p3)  ;;  %v279_v9 = vld [vmem:[%s2001_s2 + $0x28] sm:$0xff] (!%p159_p3)  ;;  %vm826_vm1 = vcmask (!%p159_p3), 1045504   ;;  %v1480_v23 = vmov (!%p159_p3), 65535  }
   0x8   : > { %323 = vperm.xlu0 (!%p159_p3), %1405, %v274_v0   ;;  %867 = vmatprep.mubr.bf16.mxu0 (!%p159_p3), %v1479_v1  ;;  %v280_v12 = vld [vmem:[%s2001_s2 + $0x30] sm:$0xff] (!%p159_p3)  ;;  %v282_v15 = vld [vmem:[%s2001_s2 + $0x40] sm:$0xff] (!%p159_p3)  ;;  %v281_v18 = vld [vmem:[%s2001_s2 + $0x38] sm:$0xff] (!%p159_p3)  ;;  %v827_v24 = vsel (!%p159_p3), %vm825_vm0, 4294967295, %v1480_v23  ;;  %vm752_vm2 = vcmask (!%p159_p3), 1006592  }
   0x9   : > { %987 = vmatprep.mubr.bf16.mxu1 (!%p159_p3), %v1479_v1  ;;  %333 = vperm.xlu1 (!%p159_p3), %1406, %v276_v2   ;;  %v284_v19 = vld [vmem:[%s2001_s2 + $0x50] sm:$0xff] (!%p159_p3)  ;;  %v283_v20 = vld [vmem:[%s2001_s2 + $0x48] sm:$0xff] (!%p159_p3)  ;;  %v286_v25 = vld [vmem:[%s2001_s2 + $0x60] sm:$0xff] (!%p159_p3)  ;;  %v828_v30 = vsel (!%p159_p3), %vm826_vm1, %v827_v24, 0 }
   0xa   : > { %v285_v26 = vld [vmem:[%s2001_s2 + $0x58] sm:$0xff] (!%p159_p3)  ;;  %v288_v32 = vld [vmem:[%s2001_s2 + $0x70] sm:$0xff] (!%p159_p3)  ;;  %v287_v33 = vld [vmem:[%s2001_s2 + $0x68] sm:$0xff] (!%p159_p3) }
   0xb   : > { %v290_v36 = vld [vmem:[%s2001_s2 + $0x80] sm:$0xff] (!%p159_p3)  ;;  %v289_v37 = vld [vmem:[%s2001_s2 + $0x78] sm:$0xff] (!%p159_p3)  ;;  %v292_v41 = vld [vmem:[%s2001_s2 + $0x90] sm:$0xff] (!%p159_p3) }
   0xc   : > { %328 = vperm.xlu0 (!%p159_p3), %1405, %v275_v3   ;;  %v1431_v39 = vld [vmem:[%s2000_s1] sm:$0xff] (!%p159_p3)   ;;  %v291_v42 = vld [vmem:[%s2001_s2 + $0x88] sm:$0xff] (!%p159_p3)  ;;  %v293_v44 = vld [vmem:[%s2001_s2 + $0x98] sm:$0xff] (!%p159_p3) }
   0xd   : > { %338 = vperm.xlu1 (!%p159_p3), %1406, %v277_v4   ;;  %v1432_v40 = vld [vmem:[%s2000_s1 + $0x60] sm:$0xff] (!%p159_p3)   ;;  %v1433_v45 = vld [vmem:[%s2000_s1 + $0x8] sm:$0xff] (!%p159_p3)   ;;  %v296_v47 = vld [vmem:[%s2001_s2 + $0xb0] sm:$0xff] (!%p159_p3) }
   0xe   : > { %s2008_s12 = smov (!%p191_p4, %s1469_s12), 1  ;;  %v294_v43 = vld [vmem:[%s2001_s2 + $0xa0] sm:$0xff]  ;;  %v1434_v46 = vld [vmem:[%s2000_s1 + $0x68] sm:$0xff]   ;;  %v297_v50 = vld [vmem:[%s2001_s2 + $0xb8] sm:$0xff] }
   0xf   : > { %s1361_s22 = sshll.u32 %s2008_s12, 7  ;;  %v295_v48 = vld [vmem:[%s2001_s2 + $0xa8] sm:$0xff]  ;;  %v298_v49 = vld [vmem:[%s2001_s2 + $0xc0] sm:$0xff]  ;;  %v1435_v51 = vld [vmem:[%s2000_s1 + $0x10] sm:$0xff]   ;;  %s1378_s24 = smul.u32 752, %s2008_s12 }
  0x10   : > { %s1541_s27 = scalar_lea.vmem %s1999_s0, %s1361_s22  ;;  %343 = vperm.xlu0 %1405, %v278_v6   ;;  %v1436_v52 = vld [vmem:[%s2000_s1 + $0x70] sm:$0xff]   ;;  %v299_v54 = vld [vmem:[%s2001_s2 + $0xc8] sm:$0xff]  ;;  %v302_v55 = vld [vmem:[%s2001_s2 + $0xe0] sm:$0xff] }
  0x11   : > { %v1407_v5 = vld [vmem:[%s1541_s27 + $0x4] ss:$8 sps:$4 sm:$0xff]   ;;  %v1409_v7 = vld [vmem:[%s1541_s27] ss:$8 sps:$4 sm:$0xff]   ;;  %v1410_v8 = vld [vmem:[%s1541_s27 + $0x14] ss:$8 sps:$4 sm:$0xff]   ;;  %348 = vperm.xlu1 %1406, %v279_v9   ;;  %s1852_s28 = scalar_lea.vmem %s2002_s3, %s1378_s24 }
  0x12   : > { %835 = vmatprep.subr.bf16.mxu0 %v1407_v5  ;;  %1362 = vmatprep.subr.bf16.mxu1 %v1407_v5  ;;  %v1412_v10 = vld [vmem:[%s1541_s27 + $0x10] ss:$8 sps:$4 sm:$0xff]   ;;  %v1413_v11 = vld [vmem:[%s1541_s27 + $0x24] ss:$8 sps:$4 sm:$0xff]   ;;  %v1415_v13 = vld [vmem:[%s1541_s27 + $0x20] ss:$8 sps:$4 sm:$0xff]  }
  0x13   : > { %836 = vmatpush1.bf16.msra.mxu0 %v1409_v7  ;;  %1370 = vmatpush1.bf16.msra.mxu1 %v1409_v7  ;;  %v1416_v14 = vld [vmem:[%s1541_s27 + $0x34] ss:$8 sps:$4 sm:$0xff]   ;;  %v1418_v16 = vld [vmem:[%s1541_s27 + $0x30] ss:$8 sps:$4 sm:$0xff]   ;;  %v1419_v17 = vld [vmem:[%s1541_s27 + $0x44] ss:$8 sps:$4 sm:$0xff]  }
  0x14   : > { %837 = vmatprep.subr.bf16.mxu0 %v1410_v8  ;;  %1363 = vmatprep.subr.bf16.mxu1 %v1410_v8  ;;  %v1421_v21 = vld [vmem:[%s1541_s27 + $0x40] ss:$8 sps:$4 sm:$0xff]   ;;  %v1422_v22 = vld [vmem:[%s1541_s27 + $0x54] ss:$8 sps:$4 sm:$0xff]   ;;  %v1424_v27 = vld [vmem:[%s1541_s27 + $0x50] ss:$8 sps:$4 sm:$0xff]  }
  0x15   : > { %353 = vperm.xlu0 %1405, %v280_v12   ;;  %358 = vperm.xlu1 %1406, %v281_v18   ;;  %v1428_v28 = vld [vmem:[%s1541_s27 + $0x74] ss:$8 sps:$4 sm:$0x3f]   ;;  %v1425_v29 = vld [vmem:[%s1541_s27 + $0x64] ss:$8 sps:$4 sm:$0xff]  }
  0x16   : > { %v1430_v31 = vld [vmem:[%s1541_s27 + $0x70] ss:$8 sps:$4 sm:$0x3f]   ;;  %v1427_v34 = vld [vmem:[%s1541_s27 + $0x60] ss:$8 sps:$4 sm:$0xff]   ;;  %v833_v35 = vand.u32 %v1428_v28, %v828_v30 }
  0x17   : > { %838 = vmatpush1.bf16.msra.mxu0 %v1412_v10  ;;  %1371 = vmatpush1.bf16.msra.mxu1 %v1412_v10  ;;  %v830_v38 = vand.u32 %v1430_v31, %v828_v30  ;;  %v300_v53 = vld [vmem:[%s2001_s2 + $0xd0] sm:$0xff]  ;;  %v301_v56 = vld [vmem:[%s2001_s2 + $0xd8] sm:$0xff]  ;;  %v303_v60 = vld [vmem:[%s2001_s2 + $0xe8] sm:$0xff] }
  0x18   : > { %839 = vmatprep.subr.bf16.mxu0 %v1413_v11  ;;  %1364 = vmatprep.subr.bf16.mxu1 %v1413_v11  ;;  %v1437_v57 = vld [vmem:[%s2000_s1 + $0x18] sm:$0xff]   ;;  %v304_v59 = vld [vmem:[%s2001_s2 + $0xf0] sm:$0xff]  ;;  %v306_v61 = vld [vmem:[%s2001_s2 + $0x100] sm:$0xff] }
  0x19   : > { %363 = vperm.xlu0 %1405, %v282_v15   ;;  %368 = vperm.xlu1 %1406, %v283_v20   ;;  %v1438_v58 = vld [vmem:[%s2000_s1 + $0x78] sm:$0xff]   ;;  %v1439_v63 = vld [vmem:[%s2000_s1 + $0x20] sm:$0xff]   ;;  %v308_v2 = vld [vmem:[%s2001_s2 + $0x110] sm:$0xff] }
  0x1a   : > { %v305_v62 = vld [vmem:[%s2001_s2 + $0xf8] sm:$0xff]  ;;  %v1440_v0 = vld [vmem:[%s2000_s1 + $0x80] sm:$0xff]   ;;  %v307_v3 = vld [vmem:[%s2001_s2 + $0x108] sm:$0xff] }
  0x1b   : > { %840 = vmatpush1.bf16.msra.mxu0 %v1415_v13  ;;  %1372 = vmatpush1.bf16.msra.mxu1 %v1415_v13  ;;  %v310_v4 = vld [vmem:[%s2001_s2 + $0x120] sm:$0xff]  ;;  %v309_v5 = vld [vmem:[%s2001_s2 + $0x118] sm:$0xff]  ;;  %v1441_v6 = vld [vmem:[%s2000_s1 + $0x28] sm:$0xff]  }
  0x1c   : > { %841 = vmatprep.subr.bf16.mxu0 %v1416_v14  ;;  %1365 = vmatprep.subr.bf16.mxu1 %v1416_v14  ;;  %v1442_v7 = vld [vmem:[%s2000_s1 + $0x88] sm:$0xff]   ;;  %v312_v8 = vld [vmem:[%s2001_s2 + $0x130] sm:$0xff]  ;;  %v314_v10 = vld [vmem:[%s2001_s2 + $0x140] sm:$0xff] }
  0x1d   : > { %373 = vperm.xlu0 %1405, %v284_v19   ;;  %378 = vperm.xlu1 %1406, %v285_v26   ;;  %v311_v9 = vld [vmem:[%s2001_s2 + $0x128] sm:$0xff]  ;;  %v313_v11 = vld [vmem:[%s2001_s2 + $0x138] sm:$0xff]  ;;  %v1443_v12 = vld [vmem:[%s2000_s1 + $0x30] sm:$0xff]  }
  0x1e   : > { %v1444_v13 = vld [vmem:[%s2000_s1 + $0x90] sm:$0xff]   ;;  %v315_v15 = vld [vmem:[%s2001_s2 + $0x148] sm:$0xff]  ;;  %v1445_v18 = vld [vmem:[%s2000_s1 + $0x38] sm:$0xff]  }
  0x1f   : > { %842 = vmatpush1.bf16.msra.mxu0 %v1418_v16  ;;  %1373 = vmatpush1.bf16.msra.mxu1 %v1418_v16  ;;  %v316_v14 = vld [vmem:[%s2001_s2 + $0x150] sm:$0xff]  ;;  %v318_v16 = vld [vmem:[%s2001_s2 + $0x160] sm:$0xff]  ;;  %v1446_v19 = vld [vmem:[%s2000_s1 + $0x98] sm:$0xff]  }
  0x20   : > { %843 = vmatprep.subr.bf16.mxu0 %v1419_v17  ;;  %1366 = vmatprep.subr.bf16.mxu1 %v1419_v17  ;;  %v317_v17 = vld [vmem:[%s2001_s2 + $0x158] sm:$0xff]  ;;  %v320_v20 = vld [vmem:[%s2001_s2 + $0x170] sm:$0x1]  ;;  %v1448_v23 = vld [vmem:[%s2000_s1 + $0xa0] sm:$0xff]  }
  0x21   : > { %383 = vperm.xlu0 %1405, %v286_v25   ;;  %388 = vperm.xlu1 %1406, %v287_v33   ;;  %v1449_v24 = vld [vmem:[%s2000_s1 + $0x48] sm:$0xff]   ;;  %v1451_v26 = vld [vmem:[%s2000_s1 + $0x50] sm:$0xff]   ;;  %v1453_v28 = vld [vmem:[%s2000_s1 + $0x58] sm:$0xff]  }
  0x22   : > { %v1450_v25 = vld [vmem:[%s2000_s1 + $0xa8] sm:$0xff]  }
  0x23   : > { %844 = vmatpush1.bf16.msra.mxu0 %v1421_v21  ;;  %1374 = vmatpush1.bf16.msra.mxu1 %v1421_v21  ;;  %v319_v21 = vld [vmem:[%s2001_s2 + $0x168] sm:$0xff] }
  0x24   : > { %845 = vmatprep.subr.bf16.mxu0 %v1422_v22  ;;  %1367 = vmatprep.subr.bf16.mxu1 %v1422_v22  ;;  %v1447_v22 = vld [vmem:[%s2000_s1 + $0x40] sm:$0xff]  }
  0x25   : > { %393 = vperm.xlu0 %1405, %v288_v32   ;;  %398 = vperm.xlu1 %1406, %v289_v37  }
  0x27   : > { %846 = vmatpush1.bf16.msra.mxu0 %v1424_v27  ;;  %1375 = vmatpush1.bf16.msra.mxu1 %v1424_v27  ;;  %v1452_v27 = vld [vmem:[%s2000_s1 + $0xb0] sm:$0xff]  }
  0x28   : > { %847 = vmatprep.subr.bf16.mxu0 %v1425_v29  ;;  %1368 = vmatprep.subr.bf16.mxu1 %v1425_v29  ;;  %v1454_v29 = vld [vmem:[%s2000_s1 + $0xb8] ss:$0 sps:$4 sm:$0x11]  }
  0x29   : > { %403 = vperm.xlu0 %1405, %v290_v36   ;;  %408 = vperm.xlu1 %1406, %v291_v42  }
  0x2b   : > { %848 = vmatpush1.bf16.msra.mxu0 %v1427_v34  ;;  %1376 = vmatpush1.bf16.msra.mxu1 %v1427_v34 }
  0x2c   : > { %849 = vmatprep.subr.bf16.mxu0 %v833_v35  ;;  %1369 = vmatprep.subr.bf16.mxu1 %v833_v35 }
  0x2d   : > { %413 = vperm.xlu0 %1405, %v292_v41   ;;  %418 = vperm.xlu1 %1406, %v293_v44  }
  0x2f   : > { %850 = vmatpush1.bf16.msra.mxu0 %v830_v38  ;;  %1377 = vmatpush1.bf16.msra.mxu1 %v830_v38 }
  0x31   : > { %423 = vperm.xlu0 %1405, %v294_v43   ;;  %428 = vperm.xlu1 %1406, %v295_v48  }
  0x32   : > { %1335 = vmatmul.mubr.msk.bf16.vlgmr.msra.gmra.mrb[0].mxu0 %vm752_vm2, %v1431_v39  ;;  %1347 = vmatmul.mubr.msk.bf16.vlgmr.msra.gmra.mrb[0].mxu1 %vm752_vm2, %v1432_v40 }
  0x33   : > { %877 = vmatprep.mubr.bf16.mxu0 %v1479_v1  ;;  %997 = vmatprep.mubr.bf16.mxu1 %v1479_v1 }
  0x35   : > { %433 = vperm.xlu0 %1405, %v296_v47   ;;  %438 = vperm.xlu1 %1406, %v297_v50  }
  0x39   : > { %443 = vperm.xlu0 %1405, %v298_v49   ;;  %448 = vperm.xlu1 %1406, %v299_v54  }
  0x3a   : > { %1336 = vmatmul.mubr.msk.bf16.gmra.mrb[4].mxu0 %vm752_vm2, %v1433_v45  ;;  %1348 = vmatmul.mubr.msk.bf16.gmra.mrb[4].mxu1 %vm752_vm2, %v1434_v46 }
  0x3b   : > { %887 = vmatprep.mubr.bf16.mxu0 %v1479_v1  ;;  %1007 = vmatprep.mubr.bf16.mxu1 %v1479_v1 }
  0x3d   : > { %453 = vperm.xlu0 %1405, %v300_v53   ;;  %458 = vperm.xlu1 %1406, %v301_v56  }
  0x41   : > { %463 = vperm.xlu0 %1405, %v302_v55   ;;  %468 = vperm.xlu1 %1406, %v303_v60  }
  0x42   : > { %1337 = vmatmul.mubr.msk.bf16.gmra.mrb[8].mxu0 %vm752_vm2, %v1435_v51  ;;  %1349 = vmatmul.mubr.msk.bf16.gmra.mrb[8].mxu1 %vm752_vm2, %v1436_v52 }
  0x43   : > { %897 = vmatprep.mubr.bf16.mxu0 %v1479_v1  ;;  %1017 = vmatprep.mubr.bf16.mxu1 %v1479_v1 }
  0x45   : > { %473 = vperm.xlu0 %1405, %v304_v59   ;;  %478 = vperm.xlu1 %1406, %v305_v62  }
  0x49   : > { %483 = vperm.xlu0 %1405, %v306_v61   ;;  %488 = vperm.xlu1 %1406, %v307_v3  }
  0x4a   : > { %1338 = vmatmul.mubr.msk.bf16.gmra.mrb[12].mxu0 %vm752_vm2, %v1437_v57  ;;  %1350 = vmatmul.mubr.msk.bf16.gmra.mrb[12].mxu1 %vm752_vm2, %v1438_v58 }
  0x4b   : > { %907 = vmatprep.mubr.bf16.mxu0 %v1479_v1  ;;  %1027 = vmatprep.mubr.bf16.mxu1 %v1479_v1 }
  0x4d   : > { %493 = vperm.xlu0 %1405, %v308_v2   ;;  %498 = vperm.xlu1 %1406, %v309_v5  }
  0x51   : > { %503 = vperm.xlu0 %1405, %v310_v4   ;;  %508 = vperm.xlu1 %1406, %v311_v9  }
  0x52   : > { %1339 = vmatmul.mubr.msk.bf16.gmra.mrb[16].mxu0 %vm752_vm2, %v1439_v63  ;;  %1351 = vmatmul.mubr.msk.bf16.gmra.mrb[16].mxu1 %vm752_vm2, %v1440_v0 }
  0x53   : > { %917 = vmatprep.mubr.bf16.mxu0 %v1479_v1  ;;  %1037 = vmatprep.mubr.bf16.mxu1 %v1479_v1 }
  0x55   : > { %513 = vperm.xlu0 %1405, %v312_v8   ;;  %518 = vperm.xlu1 %1406, %v313_v11  }
  0x59   : > { %523 = vperm.xlu0 %1405, %v314_v10   ;;  %528 = vperm.xlu1 %1406, %v315_v15  }
  0x5a   : > { %1340 = vmatmul.mubr.msk.bf16.gmra.mrb[20].mxu0 %vm752_vm2, %v1441_v6  ;;  %1352 = vmatmul.mubr.msk.bf16.gmra.mrb[20].mxu1 %vm752_vm2, %v1442_v7 }
  0x5b   : > { %927 = vmatprep.mubr.bf16.mxu0 %v1479_v1  ;;  %1047 = vmatprep.mubr.bf16.mxu1 %v1479_v1 }
  0x5d   : > { %533 = vperm.xlu0 %1405, %v316_v14   ;;  %538 = vperm.xlu1 %1406, %v317_v17  }
  0x61   : > { %543 = vperm.xlu0 %1405, %v318_v16   ;;  %548 = vperm.xlu1 %1406, %v319_v21  }
  0x62   : > { %1341 = vmatmul.mubr.msk.bf16.gmra.mrb[24].mxu0 %vm752_vm2, %v1443_v12  ;;  %1353 = vmatmul.mubr.msk.bf16.gmra.mrb[24].mxu1 %vm752_vm2, %v1444_v13 }
  0x63   : > { %937 = vmatprep.mubr.bf16.mxu0 %v1479_v1  ;;  %1057 = vmatprep.mubr.bf16.mxu1 %v1479_v1 }
  0x65   : > { %553 = vperm.xlu0 %1405, %v320_v20  }
  0x6a   : > { %1342 = vmatmul.mubr.msk.bf16.gmra.mrb[28].mxu0 %vm752_vm2, %v1445_v18  ;;  %1354 = vmatmul.mubr.msk.bf16.gmra.mrb[28].mxu1 %vm752_vm2, %v1446_v19 }
  0x6b   : > { %947 = vmatprep.mubr.bf16.mxu0 %v1479_v1  ;;  %1067 = vmatprep.mubr.bf16.mxu1 %v1479_v1 }
  0x72   : > { %1343 = vmatmul.mubr.msk.bf16.gmra.mrb[32].mxu0 %vm752_vm2, %v1447_v22  ;;  %1355 = vmatmul.mubr.msk.bf16.gmra.mrb[32].mxu1 %vm752_vm2, %v1448_v23 }
  0x73   : > { %957 = vmatprep.mubr.bf16.mxu0 %v1479_v1  ;;  %1077 = vmatprep.mubr.bf16.mxu1 %v1479_v1 }
  0x7a   : > { %1344 = vmatmul.mubr.msk.bf16.gmra.mrb[36].mxu0 %vm752_vm2, %v1449_v24  ;;  %1356 = vmatmul.mubr.msk.bf16.gmra.mrb[36].mxu1 %vm752_vm2, %v1450_v25 }
  0x7b   : > { %967 = vmatprep.mubr.bf16.mxu0 %v1479_v1  ;;  %1087 = vmatprep.mubr.bf16.mxu1 %v1479_v1 }
  0x82   : > { %1345 = vmatmul.mubr.msk.bf16.gmra.mrb[40].mxu0 %vm752_vm2, %v1451_v26  ;;  %1357 = vmatmul.mubr.msk.bf16.gmra.mrb[40].mxu1 %vm752_vm2, %v1452_v27 }
  0x83   : > { %977 = vmatprep.mubr.bf16.mxu0 %v1479_v1  ;;  %1097 = vmatprep.mubr.bf16.mxu1 %v1479_v1 }
  0x87   : > { %v324_v30 = vpop.permute.xlu0 %323 }
  0x88   : > { %v334_v31 = vpop.permute.xlu1 %333 }
  0x8a   : > { %1346 = vmatmul.mubr.msk.bf16.gmra.mrb[44].mxu0 %vm752_vm2, %v1453_v28  ;;  %1358 = vmatmul.mubr.msk.bf16.gmra.mrb[44].mxu1 %vm752_vm2, %v1454_v29 }
  0x8b   : > { %v329_v32 = vpop.permute.xlu0 %328 }
  0x8c   : > { %v1806_v33 = vpop.permute.xlu1 %338 }
  0x8f   : > { %v1808_v34 = vpop.permute.xlu0 %343 }
  0x90   : > { %v1810_v1 = vpop.permute.xlu1 %348 }
  0x94   : > { %v1812_v35 = vpop.permute.xlu0 %353  ;;  %v1814_v36 = vpop.permute.xlu1 %358 }
  0x98   : > { %v1816_v37 = vpop.permute.xlu0 %363  ;;  %v1818_v38 = vpop.permute.xlu1 %368 }
  0x9c   : > { %v1820_v39 = vpop.permute.xlu0 %373  ;;  %v1822_v40 = vpop.permute.xlu1 %378 }
  0xa0   : > { %v1824_v41 = vpop.permute.xlu0 %383  ;;  %v1826_v42 = vpop.permute.xlu1 %388 }
  0xa4   : > { %v1828_v43 = vpop.permute.xlu0 %393  ;;  %v1830_v44 = vpop.permute.xlu1 %398 }
  0xa8   : > { %v1832_v45 = vpop.permute.xlu0 %403  ;;  %v1834_v46 = vpop.permute.xlu1 %408 }
  0xac   : > { %v1836_v47 = vpop.permute.xlu0 %413  ;;  %v1838_v48 = vpop.permute.xlu1 %418 }
  0xb0   : > { %v1840_v49 = vpop.permute.xlu0 %423  ;;  %v1842_v50 = vpop.permute.xlu1 %428 }
  0xb4   : > { %v1844_v51 = vpop.permute.xlu0 %433  ;;  %v1846_v52 = vpop.permute.xlu1 %438 }
  0xb8   : > { %v444_v53 = vpop.permute.xlu0 %443  ;;  %v449_v54 = vpop.permute.xlu1 %448 }
  0xbc   : > { %v454_v8 = vpop.permute.xlu0 %453  ;;  %v459_v9 = vpop.permute.xlu1 %458 }
  0xc0   : > { %v464_v26 = vpop.permute.xlu0 %463  ;;  %v469_v27 = vpop.permute.xlu1 %468 }
 0x105   : > { %v869_v55 = vpop.f32.mrb[0].mxu0  ;;  %v989_v56 = vpop.f32.mrb[0].mxu1 }
 0x106   : > { %v870_v57 = vadd.f32 %v869_v55, %v324_v30  ;;  %v990_v58 = vadd.f32 %v989_v56, %v444_v53  ;;  %v871_v59 = vpop.f32.mrb[1].mxu0  ;;  %v991_v60 = vpop.f32.mrb[1].mxu1 }
 0x107   : > { %v872_v61 = vadd.f32 %v871_v59, %v324_v30  ;;  %v992_v62 = vadd.f32 %v991_v60, %v444_v53  ;;  %v873_v63 = vpop.f32.mrb[2].mxu0  ;;  %v993_v0 = vpop.f32.mrb[2].mxu1 }
 0x108   : > { %1106 = vst [vmem:[%s1852_s28] sm:$0xff] %v870_v57  ;;  %1154 = vst [vmem:[%s1852_s28 + $0x180] sm:$0xff] %v990_v58  ;;  %v874_v2 = vadd.f32 %v873_v63, %v329_v32  ;;  %v994_v3 = vadd.f32 %v993_v0, %v449_v54  ;;  %v875_v4 = vpop.f32.mrb[3].mxu0  ;;  %v995_v5 = vpop.f32.mrb[3].mxu1 }
 0x109   : > { %1107 = vst [vmem:[%s1852_s28 + $0x8] sm:$0xff] %v872_v61  ;;  %1155 = vst [vmem:[%s1852_s28 + $0x188] sm:$0xff] %v992_v62  ;;  %v876_v6 = vadd.f32 %v875_v4, %v329_v32  ;;  %v996_v7 = vadd.f32 %v995_v5, %v449_v54  ;;  %v479_v63 = vpop.permute.xlu1 %478 }
 0x10a   : > { %1108 = vst [vmem:[%s1852_s28 + $0x10] sm:$0xff] %v874_v2  ;;  %1156 = vst [vmem:[%s1852_s28 + $0x190] sm:$0xff] %v994_v3 }
 0x10b   : > { %1109 = vst [vmem:[%s1852_s28 + $0x18] sm:$0xff] %v876_v6  ;;  %1157 = vst [vmem:[%s1852_s28 + $0x198] sm:$0xff] %v996_v7 }
 0x10d   : > { %v879_v10 = vpop.f32.mrb[4].mxu0  ;;  %v999_v11 = vpop.f32.mrb[4].mxu1 }
 0x10e   : > { %v880_v12 = vadd.f32 %v879_v10, %v334_v31  ;;  %v1000_v13 = vadd.f32 %v999_v11, %v454_v8  ;;  %v881_v14 = vpop.f32.mrb[5].mxu0  ;;  %v1001_v15 = vpop.f32.mrb[5].mxu1 }
 0x10f   : > { %v882_v16 = vadd.f32 %v881_v14, %v334_v31  ;;  %v1002_v17 = vadd.f32 %v1001_v15, %v454_v8  ;;  %v883_v18 = vpop.f32.mrb[6].mxu0  ;;  %v1003_v19 = vpop.f32.mrb[6].mxu1 }
 0x110   : > { %1110 = vst [vmem:[%s1852_s28 + $0x20] sm:$0xff] %v880_v12  ;;  %1158 = vst [vmem:[%s1852_s28 + $0x1a0] sm:$0xff] %v1000_v13  ;;  %v884_v20 = vadd.f32 %v883_v18, %v1806_v33  ;;  %v1004_v21 = vadd.f32 %v1003_v19, %v459_v9  ;;  %v885_v22 = vpop.f32.mrb[7].mxu0  ;;  %v1005_v23 = vpop.f32.mrb[7].mxu1 }
 0x111   : > { %1111 = vst [vmem:[%s1852_s28 + $0x28] sm:$0xff] %v882_v16  ;;  %1159 = vst [vmem:[%s1852_s28 + $0x1a8] sm:$0xff] %v1002_v17  ;;  %v886_v24 = vadd.f32 %v885_v22, %v1806_v33  ;;  %v1006_v25 = vadd.f32 %v1005_v23, %v459_v9  ;;  %v489_v16 = vpop.permute.xlu1 %488 }
 0x112   : > { %1112 = vst [vmem:[%s1852_s28 + $0x30] sm:$0xff] %v884_v20  ;;  %1160 = vst [vmem:[%s1852_s28 + $0x1b0] sm:$0xff] %v1004_v21 }
 0x113   : > { %1113 = vst [vmem:[%s1852_s28 + $0x38] sm:$0xff] %v886_v24  ;;  %1161 = vst [vmem:[%s1852_s28 + $0x1b8] sm:$0xff] %v1006_v25 }
 0x115   : > { %v889_v28 = vpop.f32.mrb[8].mxu0  ;;  %v1009_v29 = vpop.f32.mrb[8].mxu1 }
 0x116   : > { %v890_v30 = vadd.f32 %v889_v28, %v1808_v34  ;;  %v1010_v31 = vadd.f32 %v1009_v29, %v464_v26  ;;  %v891_v32 = vpop.f32.mrb[9].mxu0  ;;  %v1011_v53 = vpop.f32.mrb[9].mxu1 }
 0x117   : > { %v892_v33 = vadd.f32 %v891_v32, %v1808_v34  ;;  %v1012_v54 = vadd.f32 %v1011_v53, %v464_v26  ;;  %v893_v55 = vpop.f32.mrb[10].mxu0  ;;  %v1013_v56 = vpop.f32.mrb[10].mxu1 }
 0x118   : > { %1114 = vst [vmem:[%s1852_s28 + $0x40] sm:$0xff] %v890_v30  ;;  %1162 = vst [vmem:[%s1852_s28 + $0x1c0] sm:$0xff] %v1010_v31  ;;  %v894_v57 = vadd.f32 %v893_v55, %v1810_v1  ;;  %v1014_v58 = vadd.f32 %v1013_v56, %v469_v27  ;;  %v895_v59 = vpop.f32.mrb[11].mxu0  ;;  %v1015_v60 = vpop.f32.mrb[11].mxu1 }
 0x119   : > { %1115 = vst [vmem:[%s1852_s28 + $0x48] sm:$0xff] %v892_v33  ;;  %1163 = vst [vmem:[%s1852_s28 + $0x1c8] sm:$0xff] %v1012_v54  ;;  %v896_v61 = vadd.f32 %v895_v59, %v1810_v1  ;;  %v1016_v62 = vadd.f32 %v1015_v60, %v469_v27  ;;  %v474_v34 = vpop.permute.xlu0 %473  ;;  %v499_v32 = vpop.permute.xlu1 %498 }
 0x11a   : > { %1116 = vst [vmem:[%s1852_s28 + $0x50] sm:$0xff] %v894_v57  ;;  %1164 = vst [vmem:[%s1852_s28 + $0x1d0] sm:$0xff] %v1014_v58 }
 0x11b   : > { %1117 = vst [vmem:[%s1852_s28 + $0x58] sm:$0xff] %v896_v61  ;;  %1165 = vst [vmem:[%s1852_s28 + $0x1d8] sm:$0xff] %v1016_v62 }
 0x11d   : > { %v899_v0 = vpop.f32.mrb[12].mxu0  ;;  %v1019_v2 = vpop.f32.mrb[12].mxu1 }
 0x11e   : > { %v900_v3 = vadd.f32 %v899_v0, %v1812_v35  ;;  %v1020_v4 = vadd.f32 %v1019_v2, %v474_v34  ;;  %v901_v5 = vpop.f32.mrb[13].mxu0  ;;  %v1021_v6 = vpop.f32.mrb[13].mxu1 }
 0x11f   : > { %v902_v1 = vadd.f32 %v901_v5, %v1812_v35  ;;  %v1022_v7 = vadd.f32 %v1021_v6, %v474_v34  ;;  %v903_v8 = vpop.f32.mrb[14].mxu0  ;;  %v1023_v9 = vpop.f32.mrb[14].mxu1 }
 0x120   : > { %1118 = vst [vmem:[%s1852_s28 + $0x60] sm:$0xff] %v900_v3  ;;  %1166 = vst [vmem:[%s1852_s28 + $0x1e0] sm:$0xff] %v1020_v4  ;;  %v904_v10 = vadd.f32 %v903_v8, %v1814_v36  ;;  %v1024_v11 = vadd.f32 %v1023_v9, %v479_v63  ;;  %v905_v12 = vpop.f32.mrb[15].mxu0  ;;  %v1025_v13 = vpop.f32.mrb[15].mxu1 }
 0x121   : > { %1119 = vst [vmem:[%s1852_s28 + $0x68] sm:$0xff] %v902_v1  ;;  %1167 = vst [vmem:[%s1852_s28 + $0x1e8] sm:$0xff] %v1022_v7  ;;  %v906_v14 = vadd.f32 %v905_v12, %v1814_v36  ;;  %v1026_v15 = vadd.f32 %v1025_v13, %v479_v63  ;;  %v484_v35 = vpop.permute.xlu0 %483  ;;  %v509_v3 = vpop.permute.xlu1 %508 }
 0x122   : > { %1120 = vst [vmem:[%s1852_s28 + $0x70] sm:$0xff] %v904_v10  ;;  %1168 = vst [vmem:[%s1852_s28 + $0x1f0] sm:$0xff] %v1024_v11 }
 0x123   : > { %1121 = vst [vmem:[%s1852_s28 + $0x78] sm:$0xff] %v906_v14  ;;  %1169 = vst [vmem:[%s1852_s28 + $0x1f8] sm:$0xff] %v1026_v15 }
 0x125   : > { %v909_v17 = vpop.f32.mrb[16].mxu0  ;;  %v1029_v18 = vpop.f32.mrb[16].mxu1 }
 0x126   : > { %v910_v19 = vadd.f32 %v909_v17, %v1816_v37  ;;  %v1030_v20 = vadd.f32 %v1029_v18, %v484_v35  ;;  %v911_v21 = vpop.f32.mrb[17].mxu0  ;;  %v1031_v22 = vpop.f32.mrb[17].mxu1 }
 0x127   : > { %v912_v36 = vadd.f32 %v911_v21, %v1816_v37  ;;  %v1032_v23 = vadd.f32 %v1031_v22, %v484_v35  ;;  %v913_v24 = vpop.f32.mrb[18].mxu0  ;;  %v1033_v25 = vpop.f32.mrb[18].mxu1 }
 0x128   : > { %1122 = vst [vmem:[%s1852_s28 + $0x80] sm:$0xff] %v910_v19  ;;  %1170 = vst [vmem:[%s1852_s28 + $0x200] sm:$0xff] %v1030_v20  ;;  %v914_v26 = vadd.f32 %v913_v24, %v1818_v38  ;;  %v1034_v27 = vadd.f32 %v1033_v25, %v489_v16  ;;  %v915_v28 = vpop.f32.mrb[19].mxu0  ;;  %v1035_v29 = vpop.f32.mrb[19].mxu1 }
 0x129   : > { %1123 = vst [vmem:[%s1852_s28 + $0x88] sm:$0xff] %v912_v36  ;;  %1171 = vst [vmem:[%s1852_s28 + $0x208] sm:$0xff] %v1032_v23  ;;  %v916_v30 = vadd.f32 %v915_v28, %v1818_v38  ;;  %v1036_v31 = vadd.f32 %v1035_v29, %v489_v16  ;;  %v494_v37 = vpop.permute.xlu0 %493  ;;  %v519_v17 = vpop.permute.xlu1 %518 }
 0x12a   : > { %1124 = vst [vmem:[%s1852_s28 + $0x90] sm:$0xff] %v914_v26  ;;  %1172 = vst [vmem:[%s1852_s28 + $0x210] sm:$0xff] %v1034_v27 }
 0x12b   : > { %1125 = vst [vmem:[%s1852_s28 + $0x98] sm:$0xff] %v916_v30  ;;  %1173 = vst [vmem:[%s1852_s28 + $0x218] sm:$0xff] %v1036_v31 }
 0x12d   : > { %v919_v53 = vpop.f32.mrb[20].mxu0  ;;  %v1039_v33 = vpop.f32.mrb[20].mxu1 }
 0x12e   : > { %v920_v54 = vadd.f32 %v919_v53, %v1820_v39  ;;  %v1040_v55 = vadd.f32 %v1039_v33, %v494_v37  ;;  %v921_v56 = vpop.f32.mrb[21].mxu0  ;;  %v1041_v57 = vpop.f32.mrb[21].mxu1 }
 0x12f   : > { %v922_v38 = vadd.f32 %v921_v56, %v1820_v39  ;;  %v1042_v58 = vadd.f32 %v1041_v57, %v494_v37  ;;  %v923_v59 = vpop.f32.mrb[22].mxu0  ;;  %v1043_v60 = vpop.f32.mrb[22].mxu1 }
 0x130   : > { %1126 = vst [vmem:[%s1852_s28 + $0xa0] sm:$0xff] %v920_v54  ;;  %1174 = vst [vmem:[%s1852_s28 + $0x220] sm:$0xff] %v1040_v55  ;;  %v924_v61 = vadd.f32 %v923_v59, %v1822_v40  ;;  %v1044_v62 = vadd.f32 %v1043_v60, %v499_v32  ;;  %v925_v34 = vpop.f32.mrb[23].mxu0  ;;  %v1045_v63 = vpop.f32.mrb[23].mxu1 }
 0x131   : > { %1127 = vst [vmem:[%s1852_s28 + $0xa8] sm:$0xff] %v922_v38  ;;  %1175 = vst [vmem:[%s1852_s28 + $0x228] sm:$0xff] %v1042_v58  ;;  %v926_v0 = vadd.f32 %v925_v34, %v1822_v40  ;;  %v1046_v2 = vadd.f32 %v1045_v63, %v499_v32  ;;  %v504_v39 = vpop.permute.xlu0 %503  ;;  %v529_v37 = vpop.permute.xlu1 %528 }
 0x132   : > { %1128 = vst [vmem:[%s1852_s28 + $0xb0] sm:$0xff] %v924_v61  ;;  %1176 = vst [vmem:[%s1852_s28 + $0x230] sm:$0xff] %v1044_v62 }
 0x133   : > { %1129 = vst [vmem:[%s1852_s28 + $0xb8] sm:$0xff] %v926_v0  ;;  %1177 = vst [vmem:[%s1852_s28 + $0x238] sm:$0xff] %v1046_v2 }
 0x135   : > { %v929_v4 = vpop.f32.mrb[24].mxu0  ;;  %v1049_v5 = vpop.f32.mrb[24].mxu1 }
 0x136   : > { %v930_v6 = vadd.f32 %v929_v4, %v1824_v41  ;;  %v1050_v1 = vadd.f32 %v1049_v5, %v504_v39  ;;  %v931_v7 = vpop.f32.mrb[25].mxu0  ;;  %v1051_v8 = vpop.f32.mrb[25].mxu1 }
 0x137   : > { %v932_v40 = vadd.f32 %v931_v7, %v1824_v41  ;;  %v1052_v9 = vadd.f32 %v1051_v8, %v504_v39  ;;  %v933_v10 = vpop.f32.mrb[26].mxu0  ;;  %v1053_v11 = vpop.f32.mrb[26].mxu1 }
 0x138   : > { %1130 = vst [vmem:[%s1852_s28 + $0xc0] sm:$0xff] %v930_v6  ;;  %1178 = vst [vmem:[%s1852_s28 + $0x240] sm:$0xff] %v1050_v1  ;;  %v934_v12 = vadd.f32 %v933_v10, %v1826_v42  ;;  %v1054_v13 = vadd.f32 %v1053_v11, %v509_v3  ;;  %v935_v14 = vpop.f32.mrb[27].mxu0  ;;  %v1055_v15 = vpop.f32.mrb[27].mxu1 }
 0x139   : > { %1131 = vst [vmem:[%s1852_s28 + $0xc8] sm:$0xff] %v932_v40  ;;  %1179 = vst [vmem:[%s1852_s28 + $0x248] sm:$0xff] %v1052_v9  ;;  %v936_v35 = vadd.f32 %v935_v14, %v1826_v42  ;;  %v1056_v16 = vadd.f32 %v1055_v15, %v509_v3  ;;  %v514_v41 = vpop.permute.xlu0 %513  ;;  %v539_v0 = vpop.permute.xlu1 %538 }
 0x13a   : > { %1132 = vst [vmem:[%s1852_s28 + $0xd0] sm:$0xff] %v934_v12  ;;  %1180 = vst [vmem:[%s1852_s28 + $0x250] sm:$0xff] %v1054_v13 }
 0x13b   : > { %1133 = vst [vmem:[%s1852_s28 + $0xd8] sm:$0xff] %v936_v35  ;;  %1181 = vst [vmem:[%s1852_s28 + $0x258] sm:$0xff] %v1056_v16 }
 0x13d   : > { %v939_v18 = vpop.f32.mrb[28].mxu0  ;;  %v1059_v19 = vpop.f32.mrb[28].mxu1 }
 0x13e   : > { %v940_v20 = vadd.f32 %v939_v18, %v1828_v43  ;;  %v1060_v21 = vadd.f32 %v1059_v19, %v514_v41  ;;  %v941_v22 = vpop.f32.mrb[29].mxu0  ;;  %v1061_v36 = vpop.f32.mrb[29].mxu1 }
 0x13f   : > { %v942_v42 = vadd.f32 %v941_v22, %v1828_v43  ;;  %v1062_v23 = vadd.f32 %v1061_v36, %v514_v41  ;;  %v943_v24 = vpop.f32.mrb[30].mxu0  ;;  %v1063_v25 = vpop.f32.mrb[30].mxu1 }
 0x140   : > { %1134 = vst [vmem:[%s1852_s28 + $0xe0] sm:$0xff] %v940_v20  ;;  %1182 = vst [vmem:[%s1852_s28 + $0x260] sm:$0xff] %v1060_v21  ;;  %v944_v26 = vadd.f32 %v943_v24, %v1830_v44  ;;  %v1064_v27 = vadd.f32 %v1063_v25, %v519_v17  ;;  %v945_v28 = vpop.f32.mrb[31].mxu0  ;;  %v1065_v29 = vpop.f32.mrb[31].mxu1 }
 0x141   : > { %1135 = vst [vmem:[%s1852_s28 + $0xe8] sm:$0xff] %v942_v42  ;;  %1183 = vst [vmem:[%s1852_s28 + $0x268] sm:$0xff] %v1062_v23  ;;  %v946_v30 = vadd.f32 %v945_v28, %v1830_v44  ;;  %v1066_v31 = vadd.f32 %v1065_v29, %v519_v17  ;;  %v524_v43 = vpop.permute.xlu0 %523  ;;  %v549_v14 = vpop.permute.xlu1 %548 }
 0x142   : > { %1136 = vst [vmem:[%s1852_s28 + $0xf0] sm:$0xff] %v944_v26  ;;  %1184 = vst [vmem:[%s1852_s28 + $0x270] sm:$0xff] %v1064_v27 }
 0x143   : > { %1137 = vst [vmem:[%s1852_s28 + $0xf8] sm:$0xff] %v946_v30  ;;  %1185 = vst [vmem:[%s1852_s28 + $0x278] sm:$0xff] %v1066_v31 }
 0x145   : > { %v949_v32 = vpop.f32.mrb[32].mxu0  ;;  %v1069_v53 = vpop.f32.mrb[32].mxu1 }
 0x146   : > { %v950_v33 = vadd.f32 %v949_v32, %v1832_v45  ;;  %v1070_v54 = vadd.f32 %v1069_v53, %v524_v43  ;;  %v951_v55 = vpop.f32.mrb[33].mxu0  ;;  %v1071_v56 = vpop.f32.mrb[33].mxu1 }
 0x147   : > { %v952_v44 = vadd.f32 %v951_v55, %v1832_v45  ;;  %v1072_v57 = vadd.f32 %v1071_v56, %v524_v43  ;;  %v953_v38 = vpop.f32.mrb[34].mxu0  ;;  %v1073_v58 = vpop.f32.mrb[34].mxu1 }
 0x148   : > { %1138 = vst [vmem:[%s1852_s28 + $0x100] sm:$0xff] %v950_v33  ;;  %1186 = vst [vmem:[%s1852_s28 + $0x280] sm:$0xff] %v1070_v54  ;;  %v954_v59 = vadd.f32 %v953_v38, %v1834_v46  ;;  %v1074_v60 = vadd.f32 %v1073_v58, %v529_v37  ;;  %v955_v61 = vpop.f32.mrb[35].mxu0  ;;  %v1075_v62 = vpop.f32.mrb[35].mxu1 }
 0x149   : > { %1139 = vst [vmem:[%s1852_s28 + $0x108] sm:$0xff] %v952_v44  ;;  %1187 = vst [vmem:[%s1852_s28 + $0x288] sm:$0xff] %v1072_v57  ;;  %v956_v34 = vadd.f32 %v955_v61, %v1834_v46  ;;  %v1076_v63 = vadd.f32 %v1075_v62, %v529_v37  ;;  %v534_v45 = vpop.permute.xlu0 %533 }
 0x14a   : > { %1140 = vst [vmem:[%s1852_s28 + $0x110] sm:$0xff] %v954_v59  ;;  %1188 = vst [vmem:[%s1852_s28 + $0x290] sm:$0xff] %v1074_v60 }
 0x14b   : > { %1141 = vst [vmem:[%s1852_s28 + $0x118] sm:$0xff] %v956_v34  ;;  %1189 = vst [vmem:[%s1852_s28 + $0x298] sm:$0xff] %v1076_v63 }
 0x14d   : > { %v959_v2 = vpop.f32.mrb[36].mxu0  ;;  %v1079_v39 = vpop.f32.mrb[36].mxu1 }
 0x14e   : > { %v960_v3 = vadd.f32 %v959_v2, %v1836_v47  ;;  %v1080_v4 = vadd.f32 %v1079_v39, %v534_v45  ;;  %v961_v5 = vpop.f32.mrb[37].mxu0  ;;  %v1081_v6 = vpop.f32.mrb[37].mxu1 }
 0x14f   : > { %v962_v46 = vadd.f32 %v961_v5, %v1836_v47  ;;  %v1082_v1 = vadd.f32 %v1081_v6, %v534_v45  ;;  %v963_v7 = vpop.f32.mrb[38].mxu0  ;;  %v1083_v8 = vpop.f32.mrb[38].mxu1 }
 0x150   : > { %1142 = vst [vmem:[%s1852_s28 + $0x120] sm:$0xff] %v960_v3  ;;  %1190 = vst [vmem:[%s1852_s28 + $0x2a0] sm:$0xff] %v1080_v4  ;;  %v964_v40 = vadd.f32 %v963_v7, %v1838_v48  ;;  %v1084_v9 = vadd.f32 %v1083_v8, %v539_v0  ;;  %v965_v10 = vpop.f32.mrb[39].mxu0  ;;  %v1085_v11 = vpop.f32.mrb[39].mxu1 }
 0x151   : > { %1143 = vst [vmem:[%s1852_s28 + $0x128] sm:$0xff] %v962_v46  ;;  %1191 = vst [vmem:[%s1852_s28 + $0x2a8] sm:$0xff] %v1082_v1  ;;  %v966_v12 = vadd.f32 %v965_v10, %v1838_v48  ;;  %v1086_v13 = vadd.f32 %v1085_v11, %v539_v0  ;;  %v544_v47 = vpop.permute.xlu0 %543 }
 0x152   : > { %1144 = vst [vmem:[%s1852_s28 + $0x130] sm:$0xff] %v964_v40  ;;  %1192 = vst [vmem:[%s1852_s28 + $0x2b0] sm:$0xff] %v1084_v9 }
 0x153   : > { %1145 = vst [vmem:[%s1852_s28 + $0x138] sm:$0xff] %v966_v12  ;;  %1193 = vst [vmem:[%s1852_s28 + $0x2b8] sm:$0xff] %v1086_v13 }
 0x155   : > { %v969_v15 = vpop.f32.mrb[40].mxu0  ;;  %v1089_v35 = vpop.f32.mrb[40].mxu1 }
 0x156   : > { %v970_v16 = vadd.f32 %v969_v15, %v1840_v49  ;;  %v1090_v41 = vadd.f32 %v1089_v35, %v544_v47  ;;  %v971_v17 = vpop.f32.mrb[41].mxu0  ;;  %v1091_v18 = vpop.f32.mrb[41].mxu1 }
 0x157   : > { %v972_v48 = vadd.f32 %v971_v17, %v1840_v49  ;;  %v1092_v19 = vadd.f32 %v1091_v18, %v544_v47  ;;  %v973_v20 = vpop.f32.mrb[42].mxu0  ;;  %v1093_v21 = vpop.f32.mrb[42].mxu1 }
 0x158   : > { %1146 = vst [vmem:[%s1852_s28 + $0x140] sm:$0xff] %v970_v16  ;;  %1194 = vst [vmem:[%s1852_s28 + $0x2c0] sm:$0xff] %v1090_v41  ;;  %v974_v22 = vadd.f32 %v973_v20, %v1842_v50  ;;  %v1094_v36 = vadd.f32 %v1093_v21, %v549_v14  ;;  %v975_v42 = vpop.f32.mrb[43].mxu0  ;;  %v1095_v23 = vpop.f32.mrb[43].mxu1 }
 0x159   : > { %1147 = vst [vmem:[%s1852_s28 + $0x148] sm:$0xff] %v972_v48  ;;  %1195 = vst [vmem:[%s1852_s28 + $0x2c8] sm:$0xff] %v1092_v19  ;;  %v976_v24 = vadd.f32 %v975_v42, %v1842_v50  ;;  %v1096_v25 = vadd.f32 %v1095_v23, %v549_v14  ;;  %v554_v49 = vpop.permute.xlu0 %553 }
 0x15a   : > { %1148 = vst [vmem:[%s1852_s28 + $0x150] sm:$0xff] %v974_v22  ;;  %1196 = vst [vmem:[%s1852_s28 + $0x2d0] sm:$0xff] %v1094_v36 }
 0x15b   : > { %1149 = vst [vmem:[%s1852_s28 + $0x158] sm:$0xff] %v976_v24  ;;  %1197 = vst [vmem:[%s1852_s28 + $0x2d8] sm:$0xff] %v1096_v25 }
 0x15d   : > { %v979_v26 = vpop.f32.mrb[44].mxu0  ;;  %v1099_v27 = vpop.f32.mrb[44].mxu1 }
 0x15e   : > { %v980_v28 = vadd.f32 %v979_v26, %v1844_v51  ;;  %v1100_v29 = vadd.f32 %v1099_v27, %v554_v49  ;;  %v981_v30 = vpop.f32.mrb[45].mxu0  ;;  %v1101_v31 = vpop.f32.mrb[45].mxu1 }
 0x15f   : > { %v982_v50 = vadd.f32 %v981_v30, %v1844_v51  ;;  %v1102_v43 = vadd.f32 %v1101_v31, %v554_v49  ;;  %v983_v37 = vpop.f32.mrb[46].mxu0  ;;  %v1103_v32 = vpop.f32.mrb[46].mxu1 }
 0x160   : > { %1150 = vst [vmem:[%s1852_s28 + $0x160] sm:$0xff] %v980_v28  ;;  %1198 = vst [vmem:[%s1852_s28 + $0x2e0] sm:$0x1] %v1100_v29  ;;  %v984_v53 = vadd.f32 %v983_v37, %v1846_v52  ;;  %v985_v33 = vpop.f32.mrb[47].mxu0  ;;  %v1104_v54 = vpop.f32.mrb[47].mxu1 }
 0x161   : > { %1151 = vst [vmem:[%s1852_s28 + $0x168] sm:$0xff] %v982_v50  ;;  %1199 = vst [vmem:[%s1852_s28 + $0x2e8] sm:$0x1] %v1102_v43  ;;  %v986_v55 = vadd.f32 %v985_v33, %v1846_v52 }
 0x162   : > { %1152 = vst [vmem:[%s1852_s28 + $0x170] sm:$0xff] %v984_v53 }
 0x163   : > { %1153 = vst [vmem:[%s1852_s28 + $0x178] sm:$0xff] %v986_v55 }
 0x164 PF: > { %s13_s14 = sadd.s32 1, %s1477_s14   ;;  %s2003_s12 = smov %s1473_s13 }
 0x165   : > { %p10_p5 = scmp.ge.s32.totalorder %s13_s14, 4   ;;  %s2004_s13 = smov %s2006_s15 }
 0x167   :  { %12 = sbr.rel (!%p10_p5) target bundleno = 2 (0x2), region = 62 }

</bundles_post_ra>
